<compile_context>
chip_gen: v7x
topology: tpu7x:2x2x1
jax: 0.10.0
libtpu: 0.0.40
codegen_flags: <defaults>
</compile_context>

<pallas_src>
import functools

import jax
import jax.numpy as jnp
from jax.experimental import pallas as pl
from jax.experimental.pallas import tpu as pltpu


# --------------------------------------------------------------------------- #
# Kernels
# --------------------------------------------------------------------------- #
def policy_mlp_kernel(x_ref, w0_ref, b0_ref, w1_ref, b1_ref, w2_ref, b2_ref, o_ref):
    """One batch tile (lane-dense): logits = W2 @ relu(W1 @ relu(W0 @ x + b0) + b1) + b2."""
    mm = w0_ref.dtype                                    # matmul operand dtype (bf16 or f32)

    h = jnp.dot(w0_ref[...], x_ref[...], preferred_element_type=jnp.float32)
    h = jnp.maximum(h + b0_ref[...], 0.0)                # bias/relu stay f32

    h = jnp.dot(w1_ref[...], h.astype(mm), preferred_element_type=jnp.float32)
    h = jnp.maximum(h + b1_ref[...], 0.0)

    o_ref[...] = (jnp.dot(w2_ref[...], h.astype(mm),
                          preferred_element_type=jnp.float32) + b2_ref[...])


def softmax_kernel(z_ref, o_ref, *, axis):
    """Softmax over `axis` of the (small) logits block, exact normalization."""
    z = z_ref[...]
    m = jnp.max(z, axis=axis, keepdims=True)
    e = jnp.exp(z - m)
    o_ref[...] = e / jnp.sum(e, axis=axis, keepdims=True)


# --------------------------------------------------------------------------- #
# Wrappers
# --------------------------------------------------------------------------- #
def prepare_params(params, matmul_dtype=jnp.float32):
    """One-time preprocessing (call at init, NOT per forward).

    Weights stay in torch-native [out, in] layout (lane-dense H = W @ X needs no
    transpose), cast to the matmul dtype; biases become [out, 1] f32 columns.
    Use matmul_dtype=jnp.bfloat16 on v6e/v7x, jnp.float32 on v5e.
    """
    prepared = []
    for w, b in params:
        prepared.append((jnp.asarray(w).astype(matmul_dtype),
                         jnp.asarray(b).reshape(-1, 1).astype(jnp.float32)))
    return tuple(prepared)


def _pick_batch_tile(batch, requested=None):
    """Batch sits on the 128-lane axis: tiles are multiples of 128 lanes, big by default."""
    b128 = 128 * pl.cdiv(batch, 128)
    if requested is None:
        tb = 4096              # big tiles: per-grid-step overhead dominates this tiny MLP
    else:
        tb = 128 * pl.cdiv(int(requested), 128)
    return min(tb, b128)


def _softmax_pallas(z, *, axis):
    r, c = z.shape
    return pl.pallas_call(
        functools.partial(softmax_kernel, axis=axis),
        out_shape=jax.ShapeDtypeStruct((r, c), jnp.float32),
        grid_spec=pltpu.PrefetchScalarGridSpec(
            num_scalar_prefetch=0,
            grid=(1,),
            in_specs=[pl.BlockSpec((r, c), lambda i: (0, 0))],
            out_specs=pl.BlockSpec((r, c), lambda i: (0, 0)),
        ),
    )(z)


def policy_network_forward(x, prepared_params, *, block_batch=None):
    """x: [B, in_dim] (batched) or [in_dim] (single state), float32.

    Returns F.softmax(logits, dim=0) exactly as the PyTorch module:
    over the batch axis for 2-D input, over the action axis for 1-D input.
    """
    (w0, b0), (w1, b1), (w2, b2) = prepared_params
    unbatched = (x.ndim == 1)
    if unbatched:
        x = x[None, :]
    batch, in_dim = x.shape
    out_dim = w2.shape[0]
    mm_dtype = w0.dtype

    tb = _pick_batch_tile(batch, block_batch)
    b_pad = tb * pl.cdiv(batch, tb)

    # Lane-dense layout: features on sublanes, batch on lanes.  Cast x to the
    # matmul dtype once here (not per tile inside the kernel).
    x_t = jnp.transpose(x).astype(mm_dtype)              # [in_dim, B]
    if b_pad != batch:
        x_t = jnp.pad(x_t, ((0, 0), (0, b_pad - batch)))  # padded lanes are sliced off below

    def resident(arr):   # full-array block, constant index -> DMA'd once, VMEM-resident
        return pl.BlockSpec(arr.shape, lambda i: (0, 0))

    logits_t = pl.pallas_call(
        policy_mlp_kernel,
        out_shape=jax.ShapeDtypeStruct((out_dim, b_pad), jnp.float32),
        grid_spec=pltpu.PrefetchScalarGridSpec(
            num_scalar_prefetch=0,
            grid=(b_pad // tb,),
            in_specs=[
                pl.BlockSpec((in_dim, tb), lambda i: (0, i)),   # x: tiled over lanes (batch)
                resident(w0), resident(b0),
                resident(w1), resident(b1),
                resident(w2), resident(b2),
            ],
            out_specs=pl.BlockSpec((out_dim, tb), lambda i: (0, i)),  # tiled, overlapped writeback
        ),
        compiler_params=pltpu.CompilerParams(
            # No cross-tile reduction left in the kernel -> batch tiles are independent.
            dimension_semantics=("parallel",),
        ),
    )(x_t, w0, b0, w1, b1, w2, b2)

    logits_t = logits_t[:, :batch]                        # drop lane padding

    if unbatched:
        probs_t = _softmax_pallas(logits_t, axis=0)       # dim 0 of 1-D output == actions
        return probs_t[:, 0]
    probs_t = _softmax_pallas(logits_t, axis=1)           # dim 0 of [B, out] == batch == lanes
    return jnp.transpose(probs_t)                         # back to [B, out_dim]


# --------------------------------------------------------------------------- #
# Reference + init helpers
# --------------------------------------------------------------------------- #
def init_linear(key, in_dim, out_dim):
    # Deterministic init mimicking torch.nn.Linear's default uniform bound.
    kw, kb = jax.random.split(key)
    bound = 1.0 / jnp.sqrt(jnp.float32(in_dim))
    w = jax.random.uniform(kw, (out_dim, in_dim), jnp.float32, -bound, bound)
    b = jax.random.uniform(kb, (out_dim,), jnp.float32, -bound, bound)
    return w, b


def reference_forward(x, params, matmul_dtype=jnp.float32):
    """Pure-JAX mirror of the PyTorch forward for 2-D input (softmax over batch)."""
    def lin(a, w, b):
        y = jnp.dot(a.astype(matmul_dtype), jnp.transpose(w).astype(matmul_dtype),
                    preferred_element_type=jnp.float32)
        return y + b.astype(jnp.float32)

    (w0, b0), (w1, b1), (w2, b2) = params
    h = jnp.maximum(lin(x, w0, b0), 0.0)
    h = jnp.maximum(lin(h, w1, b1), 0.0)
    return jax.nn.softmax(lin(h, w2, b2), axis=0)


def reference_forward_1d(s, params):
    """Pure-JAX mirror for a single unbatched state (softmax over actions)."""
    (w0, b0), (w1, b1), (w2, b2) = params
    h = jnp.maximum(w0 @ s + b0, 0.0)
    h = jnp.maximum(w1 @ h + b1, 0.0)
    return jax.nn.softmax(w2 @ h + b2, axis=0)


# --------------------------------------------------------------------------- #
# Demo / self-test
# --------------------------------------------------------------------------- #
if __name__ == "__main__":
    # PolicyNetwork(input_shape=(4,), output_shape=(2,), hidden_layer_dims=[32, 32])
    in_dim, out_dim = 4, 2
    hidden = [32, 32]

    key = jax.random.PRNGKey(0)
    k_x, k_x2, k_s, k0, k1, k2 = jax.random.split(key, 6)
    params = [
        init_linear(k0, in_dim, hidden[0]),
        init_linear(k1, hidden[0], hidden[1]),
        init_linear(k2, hidden[1], out_dim),
    ]

    fwd = jax.jit(policy_network_forward, static_argnames=("block_batch",))

    # ---- f32 path (v5e-recommended), small batch, single tile --------------
    prepared_f32 = prepare_params(params, jnp.float32)
    x = jax.random.normal(k_x, (32, in_dim), jnp.float32)
    out = jax.block_until_ready(fwd(x, prepared_f32))
    ref = reference_forward(x, params, jnp.float32)
    assert out.shape == (32, out_dim)
    assert jnp.allclose(jnp.sum(out, axis=0), 1.0, atol=1e-4), "softmax columns must sum to 1"
    assert jnp.allclose(out, ref, atol=1e-4, rtol=1e-4), "f32 mismatch vs reference"

    # ---- bf16 MXU path (v6e/v7x), odd batch -> padded multi-tile parallel grid
    prepared_bf16 = prepare_params(params, jnp.bfloat16)
    x2 = jax.random.normal(k_x2, (1000, in_dim), jnp.float32)
    out2 = jax.block_until_ready(fwd(x2, prepared_bf16, block_batch=256))
    ref2 = reference_forward(x2, params, jnp.bfloat16)
    ref2_f32 = reference_forward(x2, params, jnp.float32)
    assert out2.shape == (1000, out_dim)
    assert jnp.allclose(jnp.sum(out2, axis=0), 1.0, atol=1e-3), "softmax columns must sum to 1"
    assert jnp.allclose(out2, ref2, atol=1e-3, rtol=1e-2), "mismatch vs matched-dtype reference"
    assert jnp.allclose(out2, ref2_f32, atol=5e-3), "mismatch vs f32 reference"

    # ---- single unbatched state: softmax(dim=0) is over the ACTION axis ----
    s = jax.random.normal(k_s, (in_dim,), jnp.float32)
    p = jax.block_until_ready(fwd(s, prepared_f32))
    ref_s = reference_forward_1d(s, params)
    assert p.shape == (out_dim,)
    assert jnp.allclose(jnp.sum(p), 1.0, atol=1e-5), "action softmax must sum to 1"
    assert jnp.allclose(p, ref_s, atol=1e-5), "1-D state mismatch vs reference"

    print("KERNEL_OK")
</pallas_src>

<mosaic_0001>
module attributes {stable_mosaic.version = 11 : i64} {
  func.func @softmax_kernel(%arg0: i32, %arg1: memref<2x32xf32, #tpu.memory_space<vmem>>, %arg2: memref<2x32xf32, #tpu.memory_space<vmem>>) attributes {dimension_semantics = [#tpu.dimension_semantics<arbitrary>], iteration_bounds = array<i64: 1>, scalar_prefetch = 0 : i64, scratch_operands = 0 : i64, tpu.core_type = #tpu.core_type<tc>, window_params = [{pipeline_mode = #tpu.pipeline_mode<synchronous>, transform_indices = @transform_0, window_bounds = array<i64: 2, 32>}, {pipeline_mode = #tpu.pipeline_mode<synchronous>, transform_indices = @transform_1, window_bounds = array<i64: 2, 32>}]} {
    %c0 = arith.constant 0 : index
    %c0_0 = arith.constant 0 : index
    %0 = vector.load %arg1[%c0, %c0_0] : memref<2x32xf32, #tpu.memory_space<vmem>>, vector<2x32xf32>
    %cst = arith.constant dense<0xFF800000> : vector<2xf32>
    %1 = vector.multi_reduction <maximumf>, %0, %cst [1] : vector<2x32xf32> to vector<2xf32>
    %2 = vector.shape_cast %1 : vector<2xf32> to vector<2x1xf32>
    %3 = vector.broadcast %2 : vector<2x1xf32> to vector<2x32xf32>
    %4 = arith.subf %0, %3 : vector<2x32xf32>
    %5 = math.exp %4 : vector<2x32xf32>
    %cst_1 = arith.constant dense<0.000000e+00> : vector<2xf32>
    %6 = vector.multi_reduction <add>, %5, %cst_1 [1] : vector<2x32xf32> to vector<2xf32>
    %7 = vector.shape_cast %6 : vector<2xf32> to vector<2x1xf32>
    %8 = vector.broadcast %7 : vector<2x1xf32> to vector<2x32xf32>
    %9 = arith.divf %5, %8 : vector<2x32xf32>
    %c0_2 = arith.constant 0 : index
    %c0_3 = arith.constant 0 : index
    %10 = vector.load %arg2[%c0_2, %c0_3] : memref<2x32xf32, #tpu.memory_space<vmem>>, vector<2x32xf32>
    tpu.vector_store %arg2[%c0_2, %c0_3], %9 {strides = array<i32>} : memref<2x32xf32, #tpu.memory_space<vmem>>, vector<2x32xf32>,
    return
  }
  func.func @transform_0(%arg0: i32) -> (i32, i32) {
    %c0_i32 = arith.constant 0 : i32
    %c0_i32_0 = arith.constant 0 : i32
    %c0_i32_1 = arith.constant 0 : i32
    return %c0_i32, %c0_i32_0 : i32, i32
  }
  func.func @transform_1(%arg0: i32) -> (i32, i32) {
    %c0_i32 = arith.constant 0 : i32
    %c0_i32_0 = arith.constant 0 : i32
    %c0_i32_1 = arith.constant 0 : i32
    return %c0_i32, %c0_i32_0 : i32, i32
  }
}

module attributes {stable_mosaic.version = 11 : i64} {
  func.func @policy_mlp_kernel(%arg0: i32, %arg1: memref<4x128xf32, #tpu.memory_space<vmem>>, %arg2: memref<32x4xf32, #tpu.memory_space<vmem>>, %arg3: memref<32x1xf32, #tpu.memory_space<vmem>>, %arg4: memref<32x32xf32, #tpu.memory_space<vmem>>, %arg5: memref<32x1xf32, #tpu.memory_space<vmem>>, %arg6: memref<2x32xf32, #tpu.memory_space<vmem>>, %arg7: memref<2x1xf32, #tpu.memory_space<vmem>>, %arg8: memref<2x128xf32, #tpu.memory_space<vmem>>) attributes {dimension_semantics = [#tpu.dimension_semantics<parallel>], iteration_bounds = array<i64: 1>, scalar_prefetch = 0 : i64, scratch_operands = 0 : i64, tpu.core_type = #tpu.core_type<tc>, window_params = [{transform_indices = @transform_0, window_bounds = array<i64: 4, 128>}, {pipeline_mode = #tpu.pipeline_mode<synchronous>, transform_indices = @transform_1, window_bounds = array<i64: 32, 4>}, {pipeline_mode = #tpu.pipeline_mode<synchronous>, transform_indices = @transform_2, window_bounds = array<i64: 32, 1>}, {pipeline_mode = #tpu.pipeline_mode<synchronous>, transform_indices = @transform_3, window_bounds = array<i64: 32, 32>}, {pipeline_mode = #tpu.pipeline_mode<synchronous>, transform_indices = @transform_4, window_bounds = array<i64: 32, 1>}, {pipeline_mode = #tpu.pipeline_mode<synchronous>, transform_indices = @transform_5, window_bounds = array<i64: 2, 32>}, {pipeline_mode = #tpu.pipeline_mode<synchronous>, transform_indices = @transform_6, window_bounds = array<i64: 2, 1>}, {transform_indices = @transform_7, window_bounds = array<i64: 2, 128>}]} {
    %c0 = arith.constant 0 : index
    %c0_0 = arith.constant 0 : index
    %0 = vector.load %arg2[%c0, %c0_0] : memref<32x4xf32, #tpu.memory_space<vmem>>, vector<32x4xf32>
    %c0_1 = arith.constant 0 : index
    %c0_2 = arith.constant 0 : index
    %1 = vector.load %arg1[%c0_1, %c0_2] : memref<4x128xf32, #tpu.memory_space<vmem>>, vector<4x128xf32>
    %cst = arith.constant dense<0.000000e+00> : vector<32x128xf32>
    %2 = tpu.matmul %0, %1, %cst {dimension_numbers = #tpu.dot_dimension_numbers<[1], [0], [0], [1], [0, 0, 1, 1], [], []>} : vector<32x4xf32>, vector<4x128xf32>, vector<32x128xf32> -> vector<32x128xf32>
    %c0_3 = arith.constant 0 : index
    %c0_4 = arith.constant 0 : index
    %3 = vector.load %arg3[%c0_3, %c0_4] : memref<32x1xf32, #tpu.memory_space<vmem>>, vector<32x1xf32>
    %4 = vector.broadcast %3 : vector<32x1xf32> to vector<32x128xf32>
    %5 = arith.addf %2, %4 : vector<32x128xf32>
    %cst_5 = arith.constant 0.000000e+00 : f32
    %6 = vector.broadcast %cst_5 : f32 to vector<32x128xf32>
    %7 = arith.maximumf %5, %6 : vector<32x128xf32>
    %c0_6 = arith.constant 0 : index
    %c0_7 = arith.constant 0 : index
    %8 = vector.load %arg4[%c0_6, %c0_7] : memref<32x32xf32, #tpu.memory_space<vmem>>, vector<32x32xf32>
    %cst_8 = arith.constant dense<0.000000e+00> : vector<32x128xf32>
    %9 = tpu.matmul %8, %7, %cst_8 {dimension_numbers = #tpu.dot_dimension_numbers<[1], [0], [0], [1], [0, 0, 1, 1], [], []>} : vector<32x32xf32>, vector<32x128xf32>, vector<32x128xf32> -> vector<32x128xf32>
    %c0_9 = arith.constant 0 : index
    %c0_10 = arith.constant 0 : index
    %10 = vector.load %arg5[%c0_9, %c0_10] : memref<32x1xf32, #tpu.memory_space<vmem>>, vector<32x1xf32>
    %11 = vector.broadcast %10 : vector<32x1xf32> to vector<32x128xf32>
    %12 = arith.addf %9, %11 : vector<32x128xf32>
    %cst_11 = arith.constant 0.000000e+00 : f32
    %13 = vector.broadcast %cst_11 : f32 to vector<32x128xf32>
    %14 = arith.maximumf %12, %13 : vector<32x128xf32>
    %c0_12 = arith.constant 0 : index
    %c0_13 = arith.constant 0 : index
    %15 = vector.load %arg6[%c0_12, %c0_13] : memref<2x32xf32, #tpu.memory_space<vmem>>, vector<2x32xf32>
    %cst_14 = arith.constant dense<0.000000e+00> : vector<2x128xf32>
    %16 = tpu.matmul %15, %14, %cst_14 {dimension_numbers = #tpu.dot_dimension_numbers<[1], [0], [0], [1], [0, 0, 1, 1], [], []>} : vector<2x32xf32>, vector<32x128xf32>, vector<2x128xf32> -> vector<2x128xf32>
    %c0_15 = arith.constant 0 : index
    %c0_16 = arith.constant 0 : index
    %17 = vector.load %arg7[%c0_15, %c0_16] : memref<2x1xf32, #tpu.memory_space<vmem>>, vector<2x1xf32>
    %18 = vector.broadcast %17 : vector<2x1xf32> to vector<2x128xf32>
    %19 = arith.addf %16, %18 : vector<2x128xf32>
    %c0_17 = arith.constant 0 : index
    %c0_18 = arith.constant 0 : index
    %20 = vector.load %arg8[%c0_17, %c0_18] : memref<2x128xf32, #tpu.memory_space<vmem>>, vector<2x128xf32>
    tpu.vector_store %arg8[%c0_17, %c0_18], %19 {strides = array<i32>} : memref<2x128xf32, #tpu.memory_space<vmem>>, vector<2x128xf32>,
    return
  }
  func.func @transform_0(%arg0: i32) -> (i32, i32) {
    %c0_i32 = arith.constant 0 : i32
    %c0_i32_0 = arith.constant 0 : i32
    return %c0_i32, %arg0 : i32, i32
  }
  func.func @transform_1(%arg0: i32) -> (i32, i32) {
    %c0_i32 = arith.constant 0 : i32
    %c0_i32_0 = arith.constant 0 : i32
    %c0_i32_1 = arith.constant 0 : i32
    return %c0_i32, %c0_i32_0 : i32, i32
  }
  func.func @transform_2(%arg0: i32) -> (i32, i32) {
    %c0_i32 = arith.constant 0 : i32
    %c0_i32_0 = arith.constant 0 : i32
    %c0_i32_1 = arith.constant 0 : i32
    return %c0_i32, %c0_i32_0 : i32, i32
  }
  func.func @transform_3(%arg0: i32) -> (i32, i32) {
    %c0_i32 = arith.constant 0 : i32
    %c0_i32_0 = arith.constant 0 : i32
    %c0_i32_1 = arith.constant 0 : i32
    return %c0_i32, %c0_i32_0 : i32, i32
  }
  func.func @transform_4(%arg0: i32) -> (i32, i32) {
    %c0_i32 = arith.constant 0 : i32
    %c0_i32_0 = arith.constant 0 : i32
    %c0_i32_1 = arith.constant 0 : i32
    return %c0_i32, %c0_i32_0 : i32, i32
  }
  func.func @transform_5(%arg0: i32) -> (i32, i32) {
    %c0_i32 = arith.constant 0 : i32
    %c0_i32_0 = arith.constant 0 : i32
    %c0_i32_1 = arith.constant 0 : i32
    return %c0_i32, %c0_i32_0 : i32, i32
  }
  func.func @transform_6(%arg0: i32) -> (i32, i32) {
    %c0_i32 = arith.constant 0 : i32
    %c0_i32_0 = arith.constant 0 : i32
    %c0_i32_1 = arith.constant 0 : i32
    return %c0_i32, %c0_i32_0 : i32, i32
  }
  func.func @transform_7(%arg0: i32) -> (i32, i32) {
    %c0_i32 = arith.constant 0 : i32
    %c0_i32_0 = arith.constant 0 : i32
    return %c0_i32, %arg0 : i32, i32
  }
}

</mosaic_0001>

<bundles_post_ra>
// kernel: policy_network_forward.3
= control target key start
LH: loop header
LB: loop body
LE: loop exit
PB: predicated region body
PF: predicated region fallthrough
CT: control target
= control target key end

     0   :  { %vm10_vm0 = vcmask 254976   ;;  %s95_s0 = inlined_call_operand.vmem [shape: f32[2,32], index: 0, kind: input, shape index: {}]   ;;  %s96_s1 = inlined_call_operand.hbm [shape: f32[2,32], index: 1, kind: output, shape index: {}]  }
   0x1   :  { %v9_v0 = vld [vmem:[%s95_s0] sm:$0x3] }
   0x2   :  { %6 = vsyncpa [#allocation3], 0  ;;  %v11_v1 = vsel %vm10_vm0, %v9_v0, -inf  ;;  %s66_s8 = smov [#allocation2]  }
   0x3   :  { %12 = vmax.xlane.f32.xlu0 %v11_v1  ;;  %s29_s9 = sshll.u32 %s66_s8, 4  ;;  %s30_s9 = int_to_ptr.vmem [resolvable:$true] %s29_s9 }
   0x4   :  { %s42_s0 = scalar_lea.vmem %s30_s9, 32  ;;  %p47_p1 = scmp.lt.s32.totalorder %s30_s9, %s30_s9 }
   0x5   :  { %p43_p0 = scmp.ne.s32.totalorder %s30_s9, %s42_s0  ;;  %p48_p2 = scmp.lt.s32.totalorder %s42_s0, %s42_s0 }
   0x7   :  { %p49_p3 = por %p48_p2, %p47_p1 }
   0x9   :  { %p50_p4 = pnand %p49_p3, %p43_p0 }
  0x90   :  { %v13_v2 = vpop.xlane.xlu0 %12 }
  0x91   :  { %v14_v3 = vsub.f32 %v9_v0, %v13_v2 }
  0x93   :  { %v15_v4 = vmul.f32 1.442695, %v14_v3 }
  0x95   :  { %38 = vpow2.f32 %v15_v4 }
  0x9f   :  { %v39_v5 = vpop.eup %38 }
  0xa0   :  { %v17_v6 = vsel %vm10_vm0, %v39_v5, 0.0 }
  0xa1   :  { %18 = vadd.xlane.f32.xlu0 %v17_v6 }
 0x12e   :  { %v19_v7 = vpop.xlane.xlu0 %18 }
 0x12f   :  { %40 = vrcp.f32 %v19_v7 }
 0x139   :  { %v41_v8 = vpop.eup %40 }
 0x13a   :  { %v21_v9 = vmul.f32 %v41_v8, %v39_v5 }
 0x13c   :  { %22 = vst.msk [vmem:[#allocation2] sm:$0x3] %vm10_vm0, %v21_v9 }
 0x13d   :  { %53 = shalt.err (!%p50_p4)
}
 0x13e   :  { %s54_s12 = scalar_lea.hbm %s96_s1, 32 }
 0x13f   :  { %p55_p5 = scmp.ne.s32.totalorder %s96_s1, %s54_s12  ;;  %p58_p6 = scmp.lt.u32.totalorder %s54_s12, %s96_s1 }
 0x141   :  { %p60_p7 = pnand %p58_p6, %p55_p5 }
 0x143   :  { %63 = shalt.err (!%p60_p7)
}
 0x144   :  { %32 = dma.vmem_to_hbm [thread:$0]  %s30_s9, 32, %s96_s1, [#allocation3]  }
 0x145   :  { %64 = dma.done.wait [#allocation3], 32  }
 0x146   :  { %65 = vsyncadd [#allocation3], 4294967264 }
 0x147   :  { %36 = vsyncpa [#allocation3], 1 }

// kernel: policy_network_forward.2
= control target key start
LH: loop header
LB: loop body
LE: loop exit
PB: predicated region body
PF: predicated region fallthrough
CT: control target
= control target key end

     0   :  { %vm68_vm0 = vcmask 1043456   ;;  %vm55_vm1 = vcmask 31744   ;;  %v457_v3 = vmov 0   ;;  %vm189_vm2 = vcmask 261120   ;;  %s570_s0 = inlined_call_operand.vmem [shape: f32[4,128], index: 0, kind: input, shape index: {}]   ;;  %s571_s1 = inlined_call_operand.vmem [shape: f32[32,4], index: 1, kind: input, shape index: {}]   ;;  %s572_s2 = inlined_call_operand.vmem [shape: f32[32,1], index: 2, kind: input, shape index: {}]   ;;  %s573_s4 = inlined_call_operand.vmem [shape: f32[32,1], index: 4, kind: input, shape index: {}]   ;;  %s574_s6 = inlined_call_operand.vmem [shape: f32[2,1], index: 6, kind: input, shape index: {}]   ;;  %s575_s3 = inlined_call_operand.vmem [shape: f32[32,32], index: 3, kind: input, shape index: {}]   ;;  %s576_s5 = inlined_call_operand.vmem [shape: f32[2,32], index: 5, kind: input, shape index: {}]   ;;  %s577_s7 = inlined_call_operand.vmem [shape: f32[2,128], index: 7, kind: output, shape index: {}]  }
   0x1   :  { %v30_v0 = vld [vmem:[%s570_s0] sm:$0xf]  ;;  %v27_v2 = vld [vmem:[%s571_s1 + $0x8] sm:$0xff]  ;;  %455 = vset.pattern.permute.xlu0 %v457_v3  ;;  %456 = vset.pattern.permute.xlu1 %v457_v3  ;;  %v28_v4 = vld [vmem:[%s571_s1 + $0x10] sm:$0xff]  ;;  %v458_v37 = vmov 0.0|0.0   ;;  %vm459_vm3 = vmmov 0  }
   0x2   :  { %v26_v1 = vld [vmem:[%s571_s1] sm:$0xff]  ;;  %404 = vmatprep.subr.msk.mxu0 %vm68_vm0, %v30_v0  ;;  %v33_v6 = vld [vmem:[%s572_s2 + $0x10] sm:$0xff]  ;;  %v32_v7 = vld [vmem:[%s572_s2 + $0x8] sm:$0xff]  ;;  %v460_v38 = vmov 0.0  }
   0x3   :  { %406 = vmatprep.mubr.msk.f32.mxu0 %vm55_vm1, %v26_v1  ;;  %v31_v5 = vld [vmem:[%s572_s2] sm:$0xff]  ;;  %405 = vmatpush3.msk.msra.mxu0 %vm68_vm0, %v30_v0  ;;  %v29_v8 = vld [vmem:[%s571_s1 + $0x18] sm:$0xff]  ;;  %v166_v11 = vld [vmem:[%s573_s4 + $0x8] sm:$0xff] }
   0x4   :  { %37 = vperm.xlu0 %455, %v31_v5   ;;  %407 = vmatmul.mubr.msk.f32.vlgmr.msra.gmra.mrb[0].mxu0 %vm55_vm1, %v27_v2  ;;  %v34_v9 = vld [vmem:[%s572_s2 + $0x18] sm:$0xff]  ;;  %v165_v10 = vld [vmem:[%s573_s4] sm:$0xff]  ;;  %v167_v12 = vld [vmem:[%s573_s4 + $0x10] sm:$0xff] }
   0x5   :  { %47 = vperm.xlu1 %456, %v33_v6   ;;  %409 = vmatprep.mubr.msk.f32.mxu0 %vm55_vm1, %v28_v4  ;;  %v168_v13 = vld [vmem:[%s573_s4 + $0x18] sm:$0xff]  ;;  %v292_v14 = vld [vmem:[%s574_s6] sm:$0x3]  ;;  %v162_v34 = vld [vmem:[%s575_s3 + $0x8] sm:$0xff] }
   0x6   :  { %v161_v15 = vld [vmem:[%s575_s3] sm:$0xff]  ;;  %v163_v35 = vld [vmem:[%s575_s3 + $0x10] sm:$0xff]  ;;  %v164_v36 = vld [vmem:[%s575_s3 + $0x18] sm:$0xff]  ;;  %445 = vmatprep.subr.bf16.mxu0 %v458_v37 }
   0x7   :  { %420 = vmatprep.mubr.msk.f32.mxu1 %vm189_vm2, %v161_v15  ;;  %v291_v57 = vld [vmem:[%s576_s5] sm:$0x3] }
   0x8   :  { %42 = vperm.xlu0 %455, %v32_v7   ;;  %410 = vmatmul.mubr.msk.f32.gmra.mrb[2].mxu0 %vm55_vm1, %v29_v8 }
   0x9   :  { %52 = vperm.xlu1 %456, %v34_v9   ;;  %434 = vmatprep.mubr.msk.f32.mxu0 %vm459_vm3, %v460_v38 }
   0xc   :  { %171 = vperm.xlu0 %455, %v165_v10  }
   0xd   :  { %176 = vperm.xlu1 %456, %v166_v11  }
  0x10   :  { %181 = vperm.xlu0 %455, %v167_v12  }
  0x11   :  { %186 = vperm.xlu1 %456, %v168_v13  }
  0x14   :  { %295 = vperm.xlu0 %455, %v292_v14  }
  0x83   :  { %v38_v16 = vpop.permute.xlu0 %37 }
  0x84   :  { %v48_v17 = vpop.permute.xlu1 %47 }
  0x87   :  { %v43_v18 = vpop.permute.xlu0 %42 }
  0x88   :  { %v53_v24 = vpop.permute.xlu1 %52 }
  0x8b   :  { %v172_v40 = vpop.permute.xlu0 %171 }
  0x8c   :  { %v177_v39 = vpop.permute.xlu1 %176 }
  0x8f   :  { %v182_v49 = vpop.permute.xlu0 %181 }
  0x90   :  { %v187_v46 = vpop.permute.xlu1 %186 }
  0x93   :  { %v296_v58 = vpop.permute.xlu0 %295 }
  0xd7   :  { %v408_v19 = vpop.f32.mrb[0].mxu0 }
  0xd8   :  { %v144_v20 = vadd.f32 %v408_v19, %v43_v18  ;;  %v138_v21 = vpop.f32.mrb[1].mxu0 }
  0xd9   :  { %v139_v22 = vadd.f32 %v138_v21, %v38_v16 }
  0xda   :  { %v158_v23 = vmax.f32 %v144_v20, 0.0 }
  0xdb   :  { %v157_v25 = vmax.f32 %v139_v22, 0.0  ;;  %v411_v26 = vpop.f32.mrb[2].mxu0 }
  0xdc   :  { %v154_v27 = vadd.f32 %v411_v26, %v53_v24  ;;  %v148_v28 = vpop.f32.mrb[3].mxu0 }
  0xdd   :  { %v149_v29 = vadd.f32 %v148_v28, %v48_v17  ;;  %v437_v30 = vpack.c.bf16 %v158_v23, %v157_v25 }
  0xde   :  { %v160_v31 = vmax.f32 %v154_v27, 0.0 }
  0xdf   :  { %v159_v32 = vmax.f32 %v149_v29, 0.0  ;;  %438 = vmatprep.subr.bf16.mxu1 %v437_v30 }
  0xe0   :  { %440 = vmatpush3.bf16.msra.mxu1 %v437_v30 }
  0xe1   :  { %v441_v33 = vpack.c.bf16 %v160_v31, %v159_v32 }
  0xe3   :  { %442 = vmatprep.subr.bf16.mxu1 %v441_v33 }
  0xe4   :  { %444 = vmatpush3.bf16.msra.mxu1 %v441_v33 }
  0xe7   :  { %421 = vmatmul.mubr.msk.f32.vlgmr.msra.gmra.mrb[0].mxu1 %vm189_vm2, %v162_v34 }
  0xe8   :  { %423 = vmatprep.mubr.msk.f32.mxu1 %vm189_vm2, %v163_v35 }
  0xeb   :  { %424 = vmatmul.mubr.msk.f32.gmra.mrb[2].mxu1 %vm189_vm2, %v164_v36 }
 0x1ba   :  { %v422_v41 = vpop.f32.mrb[0].mxu1 }
 0x1bb   :  { %v274_v42 = vadd.f32 %v422_v41, %v177_v39  ;;  %v268_v43 = vpop.f32.mrb[1].mxu1 }
 0x1bc   :  { %v269_v44 = vadd.f32 %v268_v43, %v172_v40 }
 0x1bd   :  { %v288_v45 = vmax.f32 %v274_v42, 0.0 }
 0x1be   :  { %v287_v47 = vmax.f32 %v269_v44, 0.0  ;;  %v425_v48 = vpop.f32.mrb[2].mxu1 }
 0x1bf   :  { %v284_v50 = vadd.f32 %v425_v48, %v187_v46  ;;  %v278_v51 = vpop.f32.mrb[3].mxu1 }
 0x1c0   :  { %v446_v52 = vpack.c.bf16 %v288_v45, %v287_v47  ;;  %v279_v53 = vadd.f32 %v278_v51, %v182_v49 }
 0x1c1   :  { %v290_v54 = vmax.f32 %v284_v50, 0.0 }
 0x1c2   :  { %v289_v55 = vmax.f32 %v279_v53, 0.0  ;;  %447 = vmatpush3.bf16.msra.mxu0 %v446_v52 }
 0x1c3   :  { %448 = vmatprep.subr.bf16.mxu0 %v458_v37 }
 0x1c4   :  { %v449_v56 = vpack.c.bf16 %v290_v54, %v289_v55 }
 0x1c6   :  { %450 = vmatpush3.bf16.msra.mxu0 %v449_v56 }
 0x1c9   :  { %435 = vmatmul.mubr.msk.f32.vlgmr.msra.gmra.mrb[4].mxu0 %vm189_vm2, %v291_v57 }
 0x29c   :  { %v367_v59 = vpop.f32.mrb[4].mxu0 }
 0x29d   :  { %v368_v60 = vadd.f32 %v367_v59, %v296_v58  ;;  %v436_v61 = vpop.f32.mrb[5].mxu0 }
 0x29f   :  { %371 = vst [vmem:[%s577_s7] sm:$0x3] %v368_v60 }

</bundles_post_ra>
